<compile_context>
chip_gen: v6e
topology: v6e:2x2x1
jax: 0.10.0
libtpu: 0.0.40
codegen_flags: <defaults>
</compile_context>

<pallas_src>
import jax
import jax.numpy as jnp
from jax import lax
from jax.experimental import pallas as pl
from jax.experimental.pallas import tpu as pltpu


def _round_up(x, m):
    return (x + m - 1) // m * m


def _vmem_capacity_bytes():
    try:
        info = pltpu.get_tpu_info()
        cap = getattr(info, "vmem_capacity_bytes", None)
        if cap:
            return int(cap)
    except Exception:
        pass
    return 64 * 1024 * 1024  # conservative fallback: v7x per-TensorCore VMEM


def _make_kernel(with_bias, with_attn, scale, matmul_dtype, approx_recip):
    """Build the per-(batch-block, q-tile) kernel body."""

    def kernel(*refs):
        i = 0
        bias_ref = None
        if with_bias:
            bias_ref = refs[i]
            i += 1
        q_ref, k_ref, v_ref = refs[i], refs[i + 1], refs[i + 2]
        i += 3
        out_ref = refs[i]
        i += 1
        attn_ref = refs[i] if with_attn else None

        q = q_ref[...]                      # [Bblk, TQ, Dq]
        if scale is not None:
            # Fold scale into the small Q tile (TQ*Dq muls, not TQ*No_p).
            q = q * jnp.asarray(scale, dtype=q.dtype)
        k = k_ref[...]                      # [Bblk, No_p, Dk]
        v = v_ref[...]                      # [Bblk, No_p, Dv]
        if matmul_dtype is not None:
            q = q.astype(matmul_dtype)
            k = k.astype(matmul_dtype)
            v = v.astype(matmul_dtype)

        # scores[b, q, o] = sum_d q[b, q, d] * k[b, o, d] -- contract last
        # dims with a batch dim; no explicit transpose of K.
        scores = lax.dot_general(
            q, k,
            dimension_numbers=(((2,), (2,)), ((0,), (0,))),
            preferred_element_type=jnp.float32)          # [Bblk, TQ, No_p]

        if bias_ref is not None:
            # Additive pad-mask bias (0 for valid cols, -1e30 for padding).
            scores = scores + bias_ref[...][None]

        # Numerically-stable softmax over the objects axis (dim=2 in PyTorch).
        m = jnp.max(scores, axis=-1, keepdims=True)
        e = jnp.exp(scores - m)
        denom = jnp.sum(e, axis=-1, keepdims=True)
        if approx_recip:
            recip = pl.reciprocal(denom, approx=True)    # EUP, ~free
        else:
            recip = 1.0 / denom

        if with_attn:
            weights = e * recip
            attn_ref[...] = weights.astype(attn_ref.dtype)
            result = lax.dot_general(
                weights.astype(v.dtype), v,
                dimension_numbers=(((2,), (1,)), ((0,), (0,))),
                preferred_element_type=jnp.float32)      # [Bblk, TQ, Dv]
        else:
            # Apply the reciprocal after the PV matmul: TQ*Dv muls instead of
            # normalizing the full TQ*No_p weights tile.
            result = lax.dot_general(
                e.astype(v.dtype), v,
                dimension_numbers=(((2,), (1,)), ((0,), (0,))),
                preferred_element_type=jnp.float32)
            result = result * recip
        out_ref[...] = result.astype(out_ref.dtype)

    return kernel


def attention(queries, keys, values, *,
              block_q=256,
              attn_dtype=None,
              return_attention_map=True,
              scale=None,
              matmul_dtype=None,
              approx_reciprocal=True,
              vmem_budget_bytes=None):
    """Dot-product attention.

    Returns (result, attention_map) if return_attention_map else result.
      queries [B, Nq, Dq], keys [B, No, Dk], values [B, No, Dv]
      result  [B, Nq, Dv], attention_map [B, Nq, No]

    Notes:
      * attn_dtype defaults to bfloat16 for f32 inputs (bandwidth); pass
        jnp.float32 for exact parity with the PyTorch module.
      * approx_reciprocal=True uses the EUP approximate reciprocal, so the
        attention weights do not sum to exactly 1; set False for exactness.
    """
    B, Nq, Dq = queries.shape
    Bk, No, Dk = keys.shape
    Bv, Nov, Dv = values.shape
    assert B == Bk == Bv and No == Nov and Dq == Dk

    in_isize = jnp.dtype(queries.dtype).itemsize
    if attn_dtype is None:
        attn_dtype = (jnp.bfloat16 if queries.dtype == jnp.float32
                      else queries.dtype)
    attn_isize = jnp.dtype(attn_dtype).itemsize if return_attention_map else 0

    # Pad the objects axis to a lane multiple so score tiles are lane-dense.
    No_p = _round_up(No, 128)
    needs_mask = No_p != No

    # Size the tiles from the actual chip's VMEM (v7x 64 MiB vs v5e/v6e 128).
    vmem_cap = _vmem_capacity_bytes()
    vmem_limit = int(vmem_cap * 0.75)
    budget = vmem_budget_bytes if vmem_budget_bytes is not None else vmem_cap // 2
    budget = min(budget, vmem_limit)

    # Sublane rounding follows dtype packing: f32 -> 8, bf16 -> 16, int8 -> 32.
    sub = max(8, 32 // in_isize)
    tq = min(_round_up(block_q, sub), _round_up(Nq, sub))

    def _est_bytes(bblk, t):
        io = (bblk * t * (Dq + Dv) * in_isize          # Q tile + result tile
              + bblk * t * No_p * attn_isize)          # attn tile
        kv = bblk * No_p * (Dk + Dv) * in_isize        # resident K + V
        interm = 3 * bblk * t * No_p * 4               # f32 scores / e / weights
        return 2 * (io + kv) + interm                  # double-buffered I/O

    while tq > sub and _est_bytes(1, tq) > budget:
        tq = max(sub, _round_up(tq // 2, sub))

    # Small-workload batch blocking: if one query tile covers Nq, process
    # several batch elements per grid step (amortize per-step overhead).
    bblk = 1
    if Nq <= tq:
        while bblk * 2 <= B and _est_bytes(bblk * 2, tq) <= budget:
            bblk *= 2

    # Only K/V are padded (and only when No is not lane-aligned); queries and
    # outputs use their true shapes with partial edge tiles.
    kp = keys if not needs_mask else jnp.pad(
        keys, ((0, 0), (0, No_p - No), (0, 0)))
    vp = values if not needs_mask else jnp.pad(
        values, ((0, 0), (0, No_p - No), (0, 0)))

    grid = (pl.cdiv(B, bblk), pl.cdiv(Nq, tq))

    in_specs = []
    args = []
    if needs_mask:
        col = jnp.arange(No_p, dtype=jnp.int32)
        bias = jnp.where(col < No, 0.0, -1e30).astype(jnp.float32).reshape(1, No_p)
        in_specs.append(pl.BlockSpec((1, No_p), lambda b, q: (0, 0)))
        args.append(bias)
    in_specs += [
        # Q: one (bblk, tq, Dq) tile per (b, q) grid step.
        pl.BlockSpec((bblk, tq, Dq), lambda b, q: (b, q, 0)),
        # K / V: index_map ignores the q axis -> resident across all q tiles
        # of a batch block (no redundant HBM re-fetch).
        pl.BlockSpec((bblk, No_p, Dk), lambda b, q: (b, 0, 0)),
        pl.BlockSpec((bblk, No_p, Dv), lambda b, q: (b, 0, 0)),
    ]
    args += [queries, kp, vp]

    result_shape = jax.ShapeDtypeStruct((B, Nq, Dv), queries.dtype)
    result_spec = pl.BlockSpec((bblk, tq, Dv), lambda b, q: (b, q, 0))

    if return_attention_map:
        out_shape = (result_shape,
                     jax.ShapeDtypeStruct((B, Nq, No), attn_dtype))
        out_specs = [result_spec,
                     pl.BlockSpec((bblk, tq, No_p), lambda b, q: (b, q, 0))]
    else:
        out_shape = result_shape
        out_specs = result_spec

    # Megacore (v7x): prefer sharding the batch axis so K/V are not fetched
    # twice for the same batch element; fall back to the q axis when B-blocks
    # give only one grid step.
    if grid[0] >= 2:
        dim_sems = ("parallel", "arbitrary")
    else:
        dim_sems = ("arbitrary", "parallel")

    kernel = _make_kernel(needs_mask, return_attention_map, scale,
                          matmul_dtype, approx_reciprocal)

    outs = pl.pallas_call(
        kernel,
        out_shape=out_shape,
        grid_spec=pltpu.PrefetchScalarGridSpec(
            num_scalar_prefetch=0,
            grid=grid,
            in_specs=in_specs,
            out_specs=out_specs,
        ),
        compiler_params=pltpu.CompilerParams(
            dimension_semantics=dim_sems,
            vmem_limit_bytes=vmem_limit,
        ),
    )(*args)

    if return_attention_map:
        result, attn = outs
        return result, attn
    return outs


def _reference(queries, keys, values, scale=None):
    scores = jnp.einsum("bqd,bod->bqo", queries, keys)
    if scale is not None:
        scores = scores * scale
    weights = jax.nn.softmax(scores, axis=2)
    result = jnp.einsum("bqo,bod->bqd", weights, values)
    return result, weights


if __name__ == "__main__":
    # ---- Test 1: tiny shapes matching the module spec; f32 attention map ---
    kq, kk, kv = jax.random.split(jax.random.PRNGKey(0), 3)
    B, Nq, No, D, Dv = 2, 8, 16, 32, 32
    q1 = jax.random.normal(kq, (B, Nq, D), dtype=jnp.float32)
    k1 = jax.random.normal(kk, (B, No, D), dtype=jnp.float32)
    v1 = jax.random.normal(kv, (B, No, Dv), dtype=jnp.float32)

    res1, attn1 = attention(q1, k1, v1, attn_dtype=jnp.float32)
    jax.block_until_ready(res1)
    jax.block_until_ready(attn1)
    ref_res1, ref_w1 = _reference(q1, k1, v1)
    assert res1.shape == ref_res1.shape and attn1.shape == ref_w1.shape
    assert jnp.allclose(res1, ref_res1, atol=5e-3, rtol=5e-3)
    assert jnp.allclose(attn1, ref_w1, atol=5e-3, rtol=5e-3)

    # ---- Test 2: query tiling w/ partial last tile, No padding/masking,
    #      default bf16 attention map, and the no-attention-map path --------
    k2q, k2k, k2v = jax.random.split(jax.random.PRNGKey(1), 3)
    B2, Nq2, No2, D2, Dv2 = 2, 100, 80, 64, 48
    q2 = jax.random.normal(k2q, (B2, Nq2, D2), dtype=jnp.float32)
    k2 = jax.random.normal(k2k, (B2, No2, D2), dtype=jnp.float32)
    v2 = jax.random.normal(k2v, (B2, No2, Dv2), dtype=jnp.float32)

    res2, attn2 = attention(q2, k2, v2, block_q=64)
    res2_noattn = attention(q2, k2, v2, block_q=64, return_attention_map=False)
    jax.block_until_ready(res2)
    jax.block_until_ready(attn2)
    jax.block_until_ready(res2_noattn)
    ref_res2, ref_w2 = _reference(q2, k2, v2)
    assert res2.shape == ref_res2.shape and attn2.shape == ref_w2.shape
    assert jnp.allclose(res2, ref_res2, atol=5e-3, rtol=5e-3)
    assert jnp.allclose(attn2.astype(jnp.float32), ref_w2, atol=2e-2, rtol=2e-2)
    assert jnp.allclose(res2_noattn, ref_res2, atol=5e-3, rtol=5e-3)

    # ---- Test 3: lane-aligned No (no mask/pad), batch blocking, scale ------
    k3q, k3k, k3v = jax.random.split(jax.random.PRNGKey(2), 3)
    B3, Nq3, No3, D3, Dv3 = 2, 16, 128, 32, 32
    q3 = jax.random.normal(k3q, (B3, Nq3, D3), dtype=jnp.float32)
    k3 = jax.random.normal(k3k, (B3, No3, D3), dtype=jnp.float32)
    v3 = jax.random.normal(k3v, (B3, No3, Dv3), dtype=jnp.float32)

    res3, attn3 = attention(q3, k3, v3, attn_dtype=jnp.float32)
    res3_scaled = attention(q3, k3, v3, scale=1.0 / (D3 ** 0.5),
                            return_attention_map=False)
    jax.block_until_ready(res3)
    jax.block_until_ready(attn3)
    jax.block_until_ready(res3_scaled)
    ref_res3, ref_w3 = _reference(q3, k3, v3)
    ref_res3s, _ = _reference(q3, k3, v3, scale=1.0 / (D3 ** 0.5))
    assert jnp.allclose(res3, ref_res3, atol=5e-3, rtol=5e-3)
    assert jnp.allclose(attn3, ref_w3, atol=5e-3, rtol=5e-3)
    assert jnp.allclose(res3_scaled, ref_res3s, atol=5e-3, rtol=5e-3)

    print("KERNEL_OK")
</pallas_src>

<mosaic_0001>
module attributes {stable_mosaic.version = 11 : i64} {
  func.func @kernel(%arg0: i32, %arg1: i32, %arg2: memref<1x128xf32, #tpu.memory_space<vmem>>, %arg3: memref<2x8x32xf32, #tpu.memory_space<vmem>>, %arg4: memref<2x128x32xf32, #tpu.memory_space<vmem>>, %arg5: memref<2x128x32xf32, #tpu.memory_space<vmem>>, %arg6: memref<2x8x32xf32, #tpu.memory_space<vmem>>, %arg7: memref<2x8x128xf32, #tpu.memory_space<vmem>>) attributes {dimension_semantics = [#tpu.dimension_semantics<arbitrary>, #tpu.dimension_semantics<parallel>], iteration_bounds = array<i64: 1, 1>, scalar_prefetch = 0 : i64, scratch_operands = 0 : i64, tpu.core_type = #tpu.core_type<tc>, window_params = [{pipeline_mode = #tpu.pipeline_mode<synchronous>, transform_indices = @transform_0, window_bounds = array<i64: 1, 128>}, {transform_indices = @transform_1, window_bounds = array<i64: 2, 8, 32>}, {transform_indices = @transform_2, window_bounds = array<i64: 2, 128, 32>}, {transform_indices = @transform_3, window_bounds = array<i64: 2, 128, 32>}, {transform_indices = @transform_4, window_bounds = array<i64: 2, 8, 32>}, {transform_indices = @transform_5, window_bounds = array<i64: 2, 8, 128>}]} {
    %c0 = arith.constant 0 : index
    %c0_0 = arith.constant 0 : index
    %c0_1 = arith.constant 0 : index
    %0 = vector.load %arg3[%c0, %c0_0, %c0_1] : memref<2x8x32xf32, #tpu.memory_space<vmem>>, vector<2x8x32xf32>
    %c0_2 = arith.constant 0 : index
    %c0_3 = arith.constant 0 : index
    %c0_4 = arith.constant 0 : index
    %1 = vector.load %arg4[%c0_2, %c0_3, %c0_4] : memref<2x128x32xf32, #tpu.memory_space<vmem>>, vector<2x128x32xf32>
    %c0_5 = arith.constant 0 : index
    %c0_6 = arith.constant 0 : index
    %c0_7 = arith.constant 0 : index
    %2 = vector.load %arg5[%c0_5, %c0_6, %c0_7] : memref<2x128x32xf32, #tpu.memory_space<vmem>>, vector<2x128x32xf32>
    %cst = arith.constant dense<0.000000e+00> : vector<2x8x128xf32>
    %3 = tpu.matmul %0, %1, %cst {dimension_numbers = #tpu.dot_dimension_numbers<[2], [2], [1], [1], [0, 0, 0, 1, 1, 1], [0], [0]>} : vector<2x8x32xf32>, vector<2x128x32xf32>, vector<2x8x128xf32> -> vector<2x8x128xf32>
    %c0_8 = arith.constant 0 : index
    %c0_9 = arith.constant 0 : index
    %4 = vector.load %arg2[%c0_8, %c0_9] : memref<1x128xf32, #tpu.memory_space<vmem>>, vector<1x128xf32>
    %5 = vector.shape_cast %4 : vector<1x128xf32> to vector<1x1x128xf32>
    %6 = vector.broadcast %5 : vector<1x1x128xf32> to vector<2x8x128xf32>
    %7 = arith.addf %3, %6 : vector<2x8x128xf32>
    %cst_10 = arith.constant dense<0xFF800000> : vector<2x8xf32>
    %8 = vector.multi_reduction <maximumf>, %7, %cst_10 [2] : vector<2x8x128xf32> to vector<2x8xf32>
    %9 = vector.shape_cast %8 : vector<2x8xf32> to vector<2x8x1xf32>
    %10 = vector.broadcast %9 : vector<2x8x1xf32> to vector<2x8x128xf32>
    %11 = arith.subf %7, %10 : vector<2x8x128xf32>
    %12 = math.exp %11 : vector<2x8x128xf32>
    %cst_11 = arith.constant dense<0.000000e+00> : vector<2x8xf32>
    %13 = vector.multi_reduction <add>, %12, %cst_11 [2] : vector<2x8x128xf32> to vector<2x8xf32>
    %14 = vector.shape_cast %13 : vector<2x8xf32> to vector<2x8x1xf32>
    %15 = tpu.reciprocal %14 {approx = true} : vector<2x8x1xf32> -> vector<2x8x1xf32>
    %16 = vector.broadcast %15 : vector<2x8x1xf32> to vector<2x8x128xf32>
    %17 = arith.mulf %12, %16 : vector<2x8x128xf32>
    %c0_12 = arith.constant 0 : index
    %c0_13 = arith.constant 0 : index
    %c0_14 = arith.constant 0 : index
    %18 = vector.load %arg7[%c0_12, %c0_13, %c0_14] : memref<2x8x128xf32, #tpu.memory_space<vmem>>, vector<2x8x128xf32>
    tpu.vector_store %arg7[%c0_12, %c0_13, %c0_14], %17 {strides = array<i32>} : memref<2x8x128xf32, #tpu.memory_space<vmem>>, vector<2x8x128xf32>,
    %cst_15 = arith.constant dense<0.000000e+00> : vector<2x8x32xf32>
    %19 = tpu.matmul %17, %2, %cst_15 {dimension_numbers = #tpu.dot_dimension_numbers<[2], [1], [1], [2], [0, 0, 0, 1, 1, 2], [0], [0]>} : vector<2x8x128xf32>, vector<2x128x32xf32>, vector<2x8x32xf32> -> vector<2x8x32xf32>
    %c0_16 = arith.constant 0 : index
    %c0_17 = arith.constant 0 : index
    %c0_18 = arith.constant 0 : index
    %20 = vector.load %arg6[%c0_16, %c0_17, %c0_18] : memref<2x8x32xf32, #tpu.memory_space<vmem>>, vector<2x8x32xf32>
    tpu.vector_store %arg6[%c0_16, %c0_17, %c0_18], %19 {strides = array<i32>} : memref<2x8x32xf32, #tpu.memory_space<vmem>>, vector<2x8x32xf32>,
    return
  }
  func.func @transform_0(%arg0: i32, %arg1: i32) -> (i32, i32) {
    %c0_i32 = arith.constant 0 : i32
    %c0_i32_0 = arith.constant 0 : i32
    %c0_i32_1 = arith.constant 0 : i32
    return %c0_i32, %c0_i32_0 : i32, i32
  }
  func.func @transform_1(%arg0: i32, %arg1: i32) -> (i32, i32, i32) {
    %c0_i32 = arith.constant 0 : i32
    %c0_i32_0 = arith.constant 0 : i32
    return %arg0, %arg1, %c0_i32 : i32, i32, i32
  }
  func.func @transform_2(%arg0: i32, %arg1: i32) -> (i32, i32, i32) {
    %c0_i32 = arith.constant 0 : i32
    %c0_i32_0 = arith.constant 0 : i32
    %c0_i32_1 = arith.constant 0 : i32
    return %arg0, %c0_i32, %c0_i32_0 : i32, i32, i32
  }
  func.func @transform_3(%arg0: i32, %arg1: i32) -> (i32, i32, i32) {
    %c0_i32 = arith.constant 0 : i32
    %c0_i32_0 = arith.constant 0 : i32
    %c0_i32_1 = arith.constant 0 : i32
    return %arg0, %c0_i32, %c0_i32_0 : i32, i32, i32
  }
  func.func @transform_4(%arg0: i32, %arg1: i32) -> (i32, i32, i32) {
    %c0_i32 = arith.constant 0 : i32
    %c0_i32_0 = arith.constant 0 : i32
    return %arg0, %arg1, %c0_i32 : i32, i32, i32
  }
  func.func @transform_5(%arg0: i32, %arg1: i32) -> (i32, i32, i32) {
    %c0_i32 = arith.constant 0 : i32
    %c0_i32_0 = arith.constant 0 : i32
    return %arg0, %arg1, %c0_i32 : i32, i32, i32
  }
}

</mosaic_0001>

<bundles_post_ra>
// kernel: tpu_custom_call.1
= control target key start
LH: loop header
LB: loop body
LE: loop exit
PB: predicated region body
PF: predicated region fallthrough
CT: control target
= control target key end

     0   :  { %11 = vsyncpa [#allocation3], 0  ;;  %vm94_vm0 = vcmask 261120   ;;  %v832_v2 = vmov 0.0   ;;  %vm833_vm1 = vmmov 0   ;;  %s1187_s0 = inlined_call_operand.vmem [shape: f32[1,128], index: 0, kind: input, shape index: {}]   ;;  %s1188_s1 = inlined_call_operand.vmem [shape: f32[2,8,32], index: 1, kind: input, shape index: {}]   ;;  %s1189_s2 = inlined_call_operand.vmem [shape: f32[2,128,32], index: 2, kind: input, shape index: {}]   ;;  %s1190_s3 = inlined_call_operand.vmem [shape: f32[2,128,32], index: 3, kind: input, shape index: {}]   ;;  %s1191_s4 = inlined_call_operand.hbm [shape: f32[2,8,32], index: 4, kind: output, shape index: {0}]   ;;  %s1192_s5 = inlined_call_operand.hbm [shape: f32[2,8,16], index: 5, kind: output, shape index: {1}]  }
   0x1   :  { %v38_v0 = vld [vmem:[%s1189_s2 + $0x78] sm:$0xff]  ;;  %634 = vmatprep.subr.mxu0 %v832_v2  ;;  %669 = vmatprep.subr.mxu1 %v832_v2  ;;  %v37_v3 = vld [vmem:[%s1189_s2 + $0x70] sm:$0xff]  ;;  %v36_v5 = vld [vmem:[%s1189_s2 + $0x68] sm:$0xff] }
   0x2   :  { %v54_v1 = vld [vmem:[%s1189_s2 + $0xf8] sm:$0xff]  ;;  %635 = vmatpush3.xpose.msk.msra.mxu0 %vm94_vm0, %v38_v0  ;;  %v53_v4 = vld [vmem:[%s1189_s2 + $0xf0] sm:$0xff]  ;;  %666 = vmatprep.mubr.msk.f32.mxu0 %vm833_vm1, %v832_v2  ;;  %v52_v6 = vld [vmem:[%s1189_s2 + $0xe8] sm:$0xff] }
   0x3   :  { %670 = vmatpush3.xpose.msk.msra.mxu1 %vm94_vm0, %v54_v1  ;;  %636 = vmatprep.subr.mxu0 %v832_v2  ;;  %v35_v7 = vld [vmem:[%s1189_s2 + $0x60] sm:$0xff] }
   0x4   :  { %671 = vmatprep.subr.mxu1 %v832_v2  ;;  %701 = vmatprep.mubr.msk.f32.mxu1 %vm833_vm1, %v832_v2  ;;  %v51_v8 = vld [vmem:[%s1189_s2 + $0xe0] sm:$0xff] }
   0x6   :  { %637 = vmatpush3.xpose.msk.msra.mxu0 %vm94_vm0, %v37_v3 }
   0x7   :  { %672 = vmatpush3.xpose.msk.msra.mxu1 %vm94_vm0, %v53_v4  ;;  %638 = vmatprep.subr.mxu0 %v832_v2 }
   0x8   :  { %673 = vmatprep.subr.mxu1 %v832_v2 }
   0xa   :  { %639 = vmatpush3.xpose.msk.msra.mxu0 %vm94_vm0, %v36_v5 }
   0xb   :  { %674 = vmatpush3.xpose.msk.msra.mxu1 %vm94_vm0, %v52_v6  ;;  %640 = vmatprep.subr.mxu0 %v832_v2 }
   0xc   :  { %675 = vmatprep.subr.mxu1 %v832_v2 }
   0xd   :  { %12 = vsyncpa [#allocation5], 0  ;;  %v34_v9 = vld [vmem:[%s1189_s2 + $0x58] sm:$0xff]  ;;  %v33_v11 = vld [vmem:[%s1189_s2 + $0x50] sm:$0xff]  ;;  %s834_s18 = smov [#allocation4]  }
   0xe   :  { %641 = vmatpush3.xpose.msk.msra.mxu0 %vm94_vm0, %v35_v7  ;;  %v50_v10 = vld [vmem:[%s1189_s2 + $0xd8] sm:$0xff]  ;;  %v49_v12 = vld [vmem:[%s1189_s2 + $0xd0] sm:$0xff]  ;;  %v32_v13 = vld [vmem:[%s1189_s2 + $0x48] sm:$0xff]  ;;  %s516_s19 = sshll.u32 %s834_s18, 4  ;;  %s517_s19 = int_to_ptr.vmem [resolvable:$true] %s516_s19 }
   0xf   :  { %676 = vmatpush3.xpose.msk.msra.mxu1 %vm94_vm0, %v51_v8  ;;  %642 = vmatprep.subr.mxu0 %v832_v2  ;;  %v48_v14 = vld [vmem:[%s1189_s2 + $0xc8] sm:$0xff]  ;;  %v31_v15 = vld [vmem:[%s1189_s2 + $0x40] sm:$0xff]  ;;  %v30_v17 = vld [vmem:[%s1189_s2 + $0x38] sm:$0xff]  ;;  %p793_p1 = scmp.lt.s32.totalorder %s517_s19, %s517_s19 }
  0x10   :  { %677 = vmatprep.subr.mxu1 %v832_v2  ;;  %v47_v16 = vld [vmem:[%s1189_s2 + $0xc0] sm:$0xff]  ;;  %v46_v18 = vld [vmem:[%s1189_s2 + $0xb8] sm:$0xff]  ;;  %v29_v19 = vld [vmem:[%s1189_s2 + $0x30] sm:$0xff] }
  0x11   :  { %v45_v20 = vld [vmem:[%s1189_s2 + $0xb0] sm:$0xff]  ;;  %v28_v21 = vld [vmem:[%s1189_s2 + $0x28] sm:$0xff]  ;;  %v27_v23 = vld [vmem:[%s1189_s2 + $0x20] sm:$0xff] }
  0x12   :  { %643 = vmatpush3.xpose.msk.msra.mxu0 %vm94_vm0, %v34_v9  ;;  %v44_v22 = vld [vmem:[%s1189_s2 + $0xa8] sm:$0xff]  ;;  %v43_v24 = vld [vmem:[%s1189_s2 + $0xa0] sm:$0xff]  ;;  %v26_v25 = vld [vmem:[%s1189_s2 + $0x18] sm:$0xff] }
  0x13   :  { %678 = vmatpush3.xpose.msk.msra.mxu1 %vm94_vm0, %v50_v10  ;;  %644 = vmatprep.subr.mxu0 %v832_v2  ;;  %v42_v26 = vld [vmem:[%s1189_s2 + $0x98] sm:$0xff]  ;;  %v25_v27 = vld [vmem:[%s1189_s2 + $0x10] sm:$0xff]  ;;  %v24_v29 = vld [vmem:[%s1189_s2 + $0x8] sm:$0xff] }
  0x14   :  { %679 = vmatprep.subr.mxu1 %v832_v2  ;;  %v41_v28 = vld [vmem:[%s1189_s2 + $0x90] sm:$0xff]  ;;  %v40_v30 = vld [vmem:[%s1189_s2 + $0x88] sm:$0xff]  ;;  %v23_v31 = vld [vmem:[%s1189_s2] sm:$0xff] }
  0x15   :  { %v39_v32 = vld [vmem:[%s1189_s2 + $0x80] sm:$0xff]  ;;  %v22_v34 = vld [vmem:[%s1188_s1 + $0x8] sm:$0xff]  ;;  %v70_v42 = vld [vmem:[%s1190_s3 + $0x78] sm:$0xff] }
  0x16   :  { %645 = vmatpush3.xpose.msk.msra.mxu0 %vm94_vm0, %v33_v11  ;;  %v21_v33 = vld [vmem:[%s1188_s1] sm:$0xff]  ;;  %v69_v43 = vld [vmem:[%s1190_s3 + $0x70] sm:$0xff]  ;;  %v86_v44 = vld [vmem:[%s1190_s3 + $0xf8] sm:$0xff] }
  0x17   :  { %680 = vmatpush3.xpose.msk.msra.mxu1 %vm94_vm0, %v49_v12  ;;  %646 = vmatprep.subr.mxu0 %v832_v2  ;;  %v531_v35 = vld [vmem:[%s1187_s0] ss:$0 sm:$0xff]  ;;  %v85_v45 = vld [vmem:[%s1190_s3 + $0xf0] sm:$0xff]  ;;  %v68_v46 = vld [vmem:[%s1190_s3 + $0x68] sm:$0xff] }
  0x18   :  { %681 = vmatprep.subr.mxu1 %v832_v2  ;;  %v84_v47 = vld [vmem:[%s1190_s3 + $0xe8] sm:$0xff]  ;;  %v67_v48 = vld [vmem:[%s1190_s3 + $0x60] sm:$0xff]  ;;  %v66_v50 = vld [vmem:[%s1190_s3 + $0x58] sm:$0xff] }
  0x19   :  { %v83_v49 = vld [vmem:[%s1190_s3 + $0xe0] sm:$0xff]  ;;  %v82_v51 = vld [vmem:[%s1190_s3 + $0xd8] sm:$0xff]  ;;  %v65_v52 = vld [vmem:[%s1190_s3 + $0x50] sm:$0xff] }
  0x1a   :  { %647 = vmatpush3.xpose.msk.msra.mxu0 %vm94_vm0, %v32_v13  ;;  %v81_v53 = vld [vmem:[%s1190_s3 + $0xd0] sm:$0xff]  ;;  %v64_v54 = vld [vmem:[%s1190_s3 + $0x48] sm:$0xff]  ;;  %v63_v55 = vld [vmem:[%s1190_s3 + $0x40] sm:$0xff] }
  0x1b   :  { %682 = vmatpush3.xpose.msk.msra.mxu1 %vm94_vm0, %v48_v14  ;;  %648 = vmatprep.subr.mxu0 %v832_v2  ;;  %v62_v0 = vld [vmem:[%s1190_s3 + $0x38] sm:$0xff]  ;;  %v80_v1 = vld [vmem:[%s1190_s3 + $0xc8] sm:$0xff]  ;;  %v61_v3 = vld [vmem:[%s1190_s3 + $0x30] sm:$0xff] }
  0x1c   :  { %683 = vmatprep.subr.mxu1 %v832_v2  ;;  %v79_v4 = vld [vmem:[%s1190_s3 + $0xc0] sm:$0xff]  ;;  %v60_v5 = vld [vmem:[%s1190_s3 + $0x28] sm:$0xff]  ;;  %v78_v6 = vld [vmem:[%s1190_s3 + $0xb8] sm:$0xff] }
  0x1d   :  { %v59_v7 = vld [vmem:[%s1190_s3 + $0x20] sm:$0xff]  ;;  %v77_v8 = vld [vmem:[%s1190_s3 + $0xb0] sm:$0xff]  ;;  %v58_v9 = vld [vmem:[%s1190_s3 + $0x18] sm:$0xff] }
  0x1e   :  { %649 = vmatpush3.xpose.msk.msra.mxu0 %vm94_vm0, %v31_v15  ;;  %v76_v10 = vld [vmem:[%s1190_s3 + $0xa8] sm:$0xff]  ;;  %v57_v11 = vld [vmem:[%s1190_s3 + $0x10] sm:$0xff]  ;;  %v75_v12 = vld [vmem:[%s1190_s3 + $0xa0] sm:$0xff] }
  0x1f   :  { %684 = vmatpush3.xpose.msk.msra.mxu1 %vm94_vm0, %v47_v16  ;;  %650 = vmatprep.subr.mxu0 %v832_v2  ;;  %v56_v13 = vld [vmem:[%s1190_s3 + $0x8] sm:$0xff]  ;;  %v74_v14 = vld [vmem:[%s1190_s3 + $0x98] sm:$0xff]  ;;  %v55_v15 = vld [vmem:[%s1190_s3] sm:$0xff] }
  0x20   :  { %685 = vmatprep.subr.mxu1 %v832_v2  ;;  %v73_v16 = vld [vmem:[%s1190_s3 + $0x90] sm:$0xff] }
  0x22   :  { %651 = vmatpush3.xpose.msk.msra.mxu0 %vm94_vm0, %v30_v17  ;;  %v72_v17 = vld [vmem:[%s1190_s3 + $0x88] sm:$0xff] }
  0x23   :  { %686 = vmatpush3.xpose.msk.msra.mxu1 %vm94_vm0, %v46_v18  ;;  %652 = vmatprep.subr.mxu0 %v832_v2  ;;  %v71_v18 = vld [vmem:[%s1190_s3 + $0x80] sm:$0xff]  ;;  %s788_s3 = scalar_lea.vmem %s517_s19, 256 }
  0x24   :  { %687 = vmatprep.subr.mxu1 %v832_v2  ;;  %p789_p0 = scmp.ne.s32.totalorder %s517_s19, %s788_s3  ;;  %p794_p2 = scmp.lt.s32.totalorder %s788_s3, %s788_s3 }
  0x26   :  { %653 = vmatpush3.xpose.msk.msra.mxu0 %vm94_vm0, %v29_v19  ;;  %p795_p3 = por %p794_p2, %p793_p1 }
  0x27   :  { %688 = vmatpush3.xpose.msk.msra.mxu1 %vm94_vm0, %v45_v20  ;;  %654 = vmatprep.subr.mxu0 %v832_v2 }
  0x28   :  { %689 = vmatprep.subr.mxu1 %v832_v2  ;;  %p796_p4 = pnand %p795_p3, %p789_p0 }
  0x2a   :  { %655 = vmatpush3.xpose.msk.msra.mxu0 %vm94_vm0, %v28_v21 }
  0x2b   :  { %690 = vmatpush3.xpose.msk.msra.mxu1 %vm94_vm0, %v44_v22  ;;  %656 = vmatprep.subr.mxu0 %v832_v2 }
  0x2c   :  { %691 = vmatprep.subr.mxu1 %v832_v2 }
  0x2e   :  { %657 = vmatpush3.xpose.msk.msra.mxu0 %vm94_vm0, %v27_v23 }
  0x2f   :  { %692 = vmatpush3.xpose.msk.msra.mxu1 %vm94_vm0, %v43_v24  ;;  %658 = vmatprep.subr.mxu0 %v832_v2 }
  0x30   :  { %693 = vmatprep.subr.mxu1 %v832_v2 }
  0x32   :  { %659 = vmatpush3.xpose.msk.msra.mxu0 %vm94_vm0, %v26_v25 }
  0x33   :  { %694 = vmatpush3.xpose.msk.msra.mxu1 %vm94_vm0, %v42_v26  ;;  %660 = vmatprep.subr.mxu0 %v832_v2 }
  0x34   :  { %695 = vmatprep.subr.mxu1 %v832_v2 }
  0x36   :  { %661 = vmatpush3.xpose.msk.msra.mxu0 %vm94_vm0, %v25_v27 }
  0x37   :  { %696 = vmatpush3.xpose.msk.msra.mxu1 %vm94_vm0, %v41_v28  ;;  %662 = vmatprep.subr.mxu0 %v832_v2 }
  0x38   :  { %697 = vmatprep.subr.mxu1 %v832_v2 }
  0x3a   :  { %663 = vmatpush3.xpose.msk.msra.mxu0 %vm94_vm0, %v24_v29 }
  0x3b   :  { %698 = vmatpush3.xpose.msk.msra.mxu1 %vm94_vm0, %v40_v30  ;;  %664 = vmatprep.subr.mxu0 %v832_v2 }
  0x3c   :  { %699 = vmatprep.subr.mxu1 %v832_v2 }
  0x3e   :  { %665 = vmatpush3.xpose.msk.msra.mxu0 %vm94_vm0, %v23_v31 }
  0x3f   :  { %700 = vmatpush3.xpose.msk.msra.mxu1 %vm94_vm0, %v39_v32  ;;  %704 = vmatprep.subr.mxu0 %v832_v2 }
  0x40   :  { %739 = vmatprep.subr.mxu1 %v832_v2 }
  0x41   :  { %667 = vmatmul.mubr.msk.f32.vlgmr.msra.gmra.mxu0 %vm94_vm0, %v21_v33 }
  0x42   :  { %702 = vmatmul.mubr.msk.f32.vlgmr.msra.gmra.mxu1 %vm94_vm0, %v22_v34  ;;  %736 = vmatprep.mubr.msk.f32.mxu0 %vm833_vm1, %v832_v2 }
  0x43   :  { %771 = vmatprep.mubr.msk.f32.mxu1 %vm833_vm1, %v832_v2  ;;  %705 = vmatpush3.msra.mxu0 %v70_v42 }
  0x44   :  { %706 = vmatprep.subr.mxu0 %v832_v2  ;;  %740 = vmatpush3.msra.mxu1 %v86_v44 }
  0x45   :  { %707 = vmatpush3.msra.mxu0 %v69_v43  ;;  %741 = vmatprep.subr.mxu1 %v832_v2 }
  0x46   :  { %708 = vmatprep.subr.mxu0 %v832_v2  ;;  %742 = vmatpush3.msra.mxu1 %v85_v45 }
  0x47   :  { %709 = vmatpush3.msra.mxu0 %v68_v46  ;;  %743 = vmatprep.subr.mxu1 %v832_v2 }
  0x48   :  { %710 = vmatprep.subr.mxu0 %v832_v2  ;;  %744 = vmatpush3.msra.mxu1 %v84_v47 }
  0x49   :  { %711 = vmatpush3.msra.mxu0 %v67_v48  ;;  %745 = vmatprep.subr.mxu1 %v832_v2 }
  0x4a   :  { %712 = vmatprep.subr.mxu0 %v832_v2  ;;  %746 = vmatpush3.msra.mxu1 %v83_v49 }
  0x4b   :  { %713 = vmatpush3.msra.mxu0 %v66_v50  ;;  %747 = vmatprep.subr.mxu1 %v832_v2 }
  0x4c   :  { %714 = vmatprep.subr.mxu0 %v832_v2  ;;  %748 = vmatpush3.msra.mxu1 %v82_v51 }
  0x4d   :  { %715 = vmatpush3.msra.mxu0 %v65_v52  ;;  %749 = vmatprep.subr.mxu1 %v832_v2 }
  0x4e   :  { %716 = vmatprep.subr.mxu0 %v832_v2  ;;  %750 = vmatpush3.msra.mxu1 %v81_v53 }
  0x4f   :  { %717 = vmatpush3.msra.mxu0 %v64_v54  ;;  %751 = vmatprep.subr.mxu1 %v832_v2 }
  0x50   :  { %718 = vmatprep.subr.mxu0 %v832_v2  ;;  %752 = vmatpush3.msra.mxu1 %v80_v1 }
  0x51   :  { %719 = vmatpush3.msra.mxu0 %v63_v55  ;;  %753 = vmatprep.subr.mxu1 %v832_v2 }
  0x52   :  { %720 = vmatprep.subr.mxu0 %v832_v2  ;;  %754 = vmatpush3.msra.mxu1 %v79_v4 }
  0x53   :  { %721 = vmatpush3.msra.mxu0 %v62_v0  ;;  %755 = vmatprep.subr.mxu1 %v832_v2 }
  0x54   :  { %722 = vmatprep.subr.mxu0 %v832_v2  ;;  %756 = vmatpush3.msra.mxu1 %v78_v6 }
  0x55   :  { %723 = vmatpush3.msra.mxu0 %v61_v3  ;;  %757 = vmatprep.subr.mxu1 %v832_v2 }
  0x56   :  { %724 = vmatprep.subr.mxu0 %v832_v2  ;;  %758 = vmatpush3.msra.mxu1 %v77_v8 }
  0x57   :  { %725 = vmatpush3.msra.mxu0 %v60_v5  ;;  %759 = vmatprep.subr.mxu1 %v832_v2 }
  0x58   :  { %726 = vmatprep.subr.mxu0 %v832_v2  ;;  %760 = vmatpush3.msra.mxu1 %v76_v10 }
  0x59   :  { %727 = vmatpush3.msra.mxu0 %v59_v7  ;;  %761 = vmatprep.subr.mxu1 %v832_v2 }
  0x5a   :  { %728 = vmatprep.subr.mxu0 %v832_v2  ;;  %762 = vmatpush3.msra.mxu1 %v75_v12 }
  0x5b   :  { %729 = vmatpush3.msra.mxu0 %v58_v9  ;;  %763 = vmatprep.subr.mxu1 %v832_v2 }
  0x5c   :  { %730 = vmatprep.subr.mxu0 %v832_v2  ;;  %764 = vmatpush3.msra.mxu1 %v74_v14 }
  0x5d   :  { %731 = vmatpush3.msra.mxu0 %v57_v11  ;;  %765 = vmatprep.subr.mxu1 %v832_v2 }
  0x5e   :  { %732 = vmatprep.subr.mxu0 %v832_v2  ;;  %766 = vmatpush3.msra.mxu1 %v73_v16 }
  0x5f   :  { %733 = vmatpush3.msra.mxu0 %v56_v13  ;;  %767 = vmatprep.subr.mxu1 %v832_v2 }
  0x60   :  { %734 = vmatprep.subr.mxu0 %v832_v2  ;;  %768 = vmatpush3.msra.mxu1 %v72_v17 }
  0x61   :  { %735 = vmatpush3.msra.mxu0 %v55_v15  ;;  %769 = vmatprep.subr.mxu1 %v832_v2 }
  0x62   :  { %770 = vmatpush3.msra.mxu1 %v71_v18 }
 0x101   :  { %v212_v36 = vpop.f32.mrf.mxu0 }
 0x102   :  { %v333_v37 = vpop.f32.mrf.mxu1  ;;  %v213_v38 = vadd.f32 %v531_v35, %v212_v36 }
 0x103   :  { %v668_v39 = vpop.f32.mrf.mxu0  ;;  %v334_v41 = vadd.f32 %v531_v35, %v333_v37 }
 0x104   :  { %v703_v40 = vpop.f32.mrf.mxu1  ;;  %337 = vmax.xlane.f32.xlu0 %v213_v38 }
 0x108   :  { %339 = vmax.xlane.f32.xlu0 %v334_v41 }
 0x18d   :  { %v338_v56 = vpop.xlane.xlu0 %337 }
 0x18e   :  { %v341_v57 = vsub.f32 %v213_v38, %v338_v56 }
 0x190   :  { %v343_v58 = vmul.f32 1.442695, %v341_v57 }
 0x191   :  { %v340_v59 = vpop.xlane.xlu0 %339 }
 0x192   :  { %780 = vpow2.f32 %v343_v58  ;;  %v342_v60 = vsub.f32 %v334_v41, %v340_v59 }
 0x194   :  { %v345_v61 = vmul.f32 1.442695, %v342_v60 }
 0x196   :  { %782 = vpow2.f32 %v345_v61 }
 0x19f   :  { %v781_v62 = vpop.eup %780 }
 0x1a0   :  { %347 = vadd.xlane.f32.xlu1 %v781_v62 }
 0x1a3   :  { %v1105_v63 = vpop.eup %782 }
 0x1a4   :  { %349 = vadd.xlane.f32.xlu1 %v1105_v63 }
 0x229   :  { %v348_v19 = vpop.xlane.xlu1 %347 }
 0x22a   :  { %784 = vrcp.f32 %v348_v19 }
 0x22d   :  { %v350_v20 = vpop.xlane.xlu1 %349 }
 0x22e   :  { %786 = vrcp.f32 %v350_v20 }
 0x237   :  { %v785_v21 = vpop.eup %784 }
 0x238   :  { %v353_v22 = vmul.f32 %v785_v21, %v781_v62 }
 0x23a   :  { %737 = vmatmul.mubr.f32.vlgmr.msra.gmra.mxu0 %v353_v22  ;;  %355 = vst [vmem:[#allocation4] sm:$0xff] %v353_v22 }
 0x23b   :  { %v787_v23 = vpop.eup %786 }
 0x23c   :  { %v354_v24 = vmul.f32 %v787_v23, %v1105_v63 }
 0x23e   :  { %772 = vmatmul.mubr.f32.vlgmr.msra.gmra.mxu1 %v354_v24  ;;  %356 = vst [vmem:[#allocation4 + $0x8] sm:$0xff] %v354_v24 }
 0x23f   :  { %799 = shalt.err (!%p796_p4)
}
 0x240   :  { %s835_s20 = smov 128   ;;  %s836_s21 = smov 8  }
 0x241   :  { %522 = dma.vmem_to_hbm [thread:$0]  %s517_s19, 256, %s1192_s5, [#allocation5], %s835_s20, %s835_s20, %s836_s21  }
 0x242   :  { %s837_s24 = smov [#allocation2]  }
 0x243   :  { %s504_s25 = sshll.u32 %s837_s24, 4  ;;  %s505_s25 = int_to_ptr.vmem [resolvable:$true] %s504_s25 }
 0x244   :  { %s808_s26 = scalar_lea.vmem %s505_s25, 256  ;;  %p813_p6 = scmp.lt.s32.totalorder %s505_s25, %s505_s25 }
 0x245   :  { %p809_p5 = scmp.ne.s32.totalorder %s505_s25, %s808_s26  ;;  %p814_p7 = scmp.lt.s32.totalorder %s808_s26, %s808_s26 }
 0x247   :  { %p815_p8 = por %p814_p7, %p813_p6 }
 0x249   :  { %p816_p9 = pnand %p815_p8, %p809_p5 }
 0x2fa   :  { %v423_v2 = vpop.f32.mrf.mxu0 }
 0x2fb   :  { %497 = vst.msk [vmem:[#allocation2] sm:$0xff] %vm94_vm0, %v423_v2 }
 0x2fc   :  { %v738_v25 = vpop.f32.mrf.mxu0 }
 0x2fe   :  { %v493_v26 = vpop.f32.mrf.mxu1 }
 0x2ff   :  { %498 = vst.msk [vmem:[#allocation2 + $0x8] sm:$0xff] %vm94_vm0, %v493_v26 }
 0x300   :  { %v773_v27 = vpop.f32.mrf.mxu1 }
 0x301   :  { %819 = shalt.err (!%p816_p9)
}
 0x302   :  { %510 = dma.vmem_to_hbm [thread:$0]  %s505_s25, 256, %s1191_s4, [#allocation3], %s835_s20, %s835_s20, %s836_s21  }
 0x303   :  { %828 = dma.done.wait [#allocation3], 256  }
 0x304   :  { %829 = vsyncadd [#allocation3], 4294967040 }
 0x305   :  { %830 = dma.done.wait [#allocation5], 256  }
 0x306   :  { %831 = vsyncadd [#allocation5], 4294967040 }
 0x307   :  { %529 = vsyncpa [#allocation3], 1 }
 0x308   :  { %530 = vsyncpa [#allocation5], 1 }

</bundles_post_ra>
